<compile_context>
chip_gen: v6e
topology: v6e:2x2x1
jax: 0.10.0
libtpu: 0.0.40
codegen_flags: <defaults>
</compile_context>

<pallas_src>
import functools

import jax
import jax.numpy as jnp
from jax.experimental import pallas as pl
from jax.experimental.pallas import tpu as pltpu

EPS = 1e-5
EXPANSION = 4


# ----------------------------------------------------------------------------
# Fused Bottleneck kernel (one image per grid step, channels-first, flat HW)
# ----------------------------------------------------------------------------
def _bottleneck_kernel(x_ref, mask_ref, w1_ref, b1_ref, w2_ref, b2_ref,
                       w3_ref, b3_ref, o_ref, buf_ref, *, wp):
    planes = w1_ref.shape[0]
    S = x_ref.shape[2]               # (H+2)*(W+2) flattened padded frame
    M = wp + 1                       # zero margin of the flat scratch buffer

    dn = (((1,), (0,)), ((), ()))    # (M,K) x (K,N) contraction

    xp = x_ref[0]                    # (Cin, S) bf16 (zero on the padded ring)
    mask = mask_ref[...]             # (1, S)  f32, 1 at interior, 0 on ring

    # ---- stage 1: 1x1 conv (BN folded) + ReLU --------------------------------
    # Masking the ring makes out1 exactly conv2's zero-padded input (the ring
    # would otherwise hold relu(b1), since conv1-of-zero is only the bias).
    a1 = jax.lax.dot_general(w1_ref[...], xp, dn,
                             preferred_element_type=jnp.float32)
    out1 = jnp.maximum(a1 + b1_ref[...], 0.0) * mask          # (P, S) f32

    # ---- stage 2: 3x3 conv as ONE im2col matmul (K = 9*planes) ---------------
    # out1 is copied into a flat scratch with an M-wide zero margin on both
    # ends; each of the 9 taps is then a static lane-offset window of it.
    buf_ref[:, 0:M] = jnp.zeros((planes, M), jnp.float32)
    buf_ref[:, M + S:M + S + M] = jnp.zeros((planes, M), jnp.float32)
    buf_ref[:, M:M + S] = out1
    taps = []
    for dy in (-1, 0, 1):
        for dx in (-1, 0, 1):
            s = dy * wp + dx
            taps.append(buf_ref[:, M + s:M + s + S])
    patches = jnp.concatenate(taps, axis=0).astype(jnp.bfloat16)   # (9P, S)
    a2 = jax.lax.dot_general(w2_ref[...], patches, dn,
                             preferred_element_type=jnp.float32)
    out2 = jnp.maximum(a2 + b2_ref[...], 0.0)                  # (P, S) f32

    # ---- stage 3: 1x1 conv + 1x1 shortcut fused into one matmul + ReLU -------
    cat = jnp.concatenate([out2.astype(jnp.bfloat16), xp], axis=0)  # (P+Cin, S)
    a3 = jax.lax.dot_general(w3_ref[...], cat, dn,
                             preferred_element_type=jnp.float32)
    o_ref[0] = jnp.maximum(a3 + b3_ref[...], 0.0).astype(o_ref.dtype)


# ----------------------------------------------------------------------------
# Parameter construction / BN folding
# ----------------------------------------------------------------------------
def fold_bn(gamma, beta, mean, var):
    scale = gamma / jnp.sqrt(var + EPS)
    bias = beta - mean * scale
    return scale, bias


def make_params(key, in_planes, planes):
    out_planes = EXPANSION * planes
    ks = jax.random.split(key, 8)

    def bn_params(k, c):
        a, b, c_, d = jax.random.split(k, 4)
        gamma = 1.0 + 0.1 * jax.random.normal(a, (c,), jnp.float32)
        beta = 0.1 * jax.random.normal(b, (c,), jnp.float32)
        mean = 0.1 * jax.random.normal(c_, (c,), jnp.float32)
        var = 1.0 + 0.1 * jnp.abs(jax.random.normal(d, (c,), jnp.float32))
        return gamma, beta, mean, var

    return {
        # PyTorch conv weight layout: (O, I, kH, kW)
        "w1": 0.1 * jax.random.normal(ks[0], (planes, in_planes, 1, 1), jnp.float32),
        "bn1": bn_params(ks[1], planes),
        "w2": 0.1 * jax.random.normal(ks[2], (planes, planes, 3, 3), jnp.float32),
        "bn2": bn_params(ks[3], planes),
        "w3": 0.1 * jax.random.normal(ks[4], (out_planes, planes, 1, 1), jnp.float32),
        "bn3": bn_params(ks[5], out_planes),
        "wsc": 0.1 * jax.random.normal(ks[6], (out_planes, in_planes, 1, 1), jnp.float32),
        "bnsc": bn_params(ks[7], out_planes),
    }


# ----------------------------------------------------------------------------
# Bottleneck forward (Pallas)
# ----------------------------------------------------------------------------
def bottleneck_forward(x_nchw, params):
    N, Cin, H, W = x_nchw.shape
    planes = params["w1"].shape[0]
    out_planes = EXPANSION * planes
    Hp, Wp = H + 2, W + 2
    S = Hp * Wp

    # Pad x by 1px so conv1 runs on the padded frame (the in-kernel ring mask
    # then makes out1 exactly conv2's zero-padded input); flatten spatial into
    # the lane dim and cast MXU operands to bf16.
    xp = jnp.pad(x_nchw, ((0, 0), (0, 0), (1, 1), (1, 1)))
    xp = xp.reshape(N, Cin, S).astype(jnp.bfloat16)

    # Border mask: 1 at interior pixels, 0 on the 1-px ring (f32, lane-dense).
    mask = jnp.zeros((Hp, Wp), jnp.float32).at[1:H + 1, 1:W + 1].set(1.0)
    mask = mask.reshape(1, S)

    # Fold BN scale into the conv weights (inference form); only biases enter
    # the kernel.
    s1, b1 = fold_bn(*params["bn1"])
    s2, b2 = fold_bn(*params["bn2"])
    s3, b3 = fold_bn(*params["bn3"])

    w1 = (params["w1"][:, :, 0, 0] * s1[:, None]).astype(jnp.bfloat16)   # (P, Cin)
    w2 = (jnp.transpose(params["w2"], (0, 2, 3, 1)).reshape(planes, 9 * planes)
          * s2[:, None]).astype(jnp.bfloat16)                            # (P, 9P)
    w3 = params["w3"][:, :, 0, 0] * s3[:, None]                          # (4P, P)

    if params.get("wsc", None) is not None:
        ssc, bsc = fold_bn(*params["bnsc"])
        wsc = params["wsc"][:, :, 0, 0] * ssc[:, None]                   # (4P, Cin)
    else:
        # Identity shortcut (in_planes == expansion*planes, stride == 1).
        wsc = jnp.eye(out_planes, Cin, dtype=jnp.float32)
        bsc = jnp.zeros((out_planes,), jnp.float32)

    # Fuse conv3 + shortcut into one matmul: stack along K, pre-sum biases.
    w3sc = jnp.concatenate([w3, wsc], axis=1).astype(jnp.bfloat16)       # (4P, P+Cin)
    b1c = b1.reshape(planes, 1)
    b2c = b2.reshape(planes, 1)
    b3c = (b3 + bsc).reshape(out_planes, 1)

    kernel = functools.partial(_bottleneck_kernel, wp=Wp)

    out_flat = pl.pallas_call(
        kernel,
        out_shape=jax.ShapeDtypeStruct((N, out_planes, S), jnp.float32),
        grid_spec=pltpu.PrefetchScalarGridSpec(
            num_scalar_prefetch=0,
            grid=(N,),
            in_specs=[
                pl.BlockSpec((1, Cin, S), lambda n: (n, 0, 0)),
                pl.BlockSpec((1, S), lambda n: (0, 0)),
                pl.BlockSpec((planes, Cin), lambda n: (0, 0)),
                pl.BlockSpec((planes, 1), lambda n: (0, 0)),
                pl.BlockSpec((planes, 9 * planes), lambda n: (0, 0)),
                pl.BlockSpec((planes, 1), lambda n: (0, 0)),
                pl.BlockSpec((out_planes, planes + Cin), lambda n: (0, 0)),
                pl.BlockSpec((out_planes, 1), lambda n: (0, 0)),
            ],
            out_specs=pl.BlockSpec((1, out_planes, S), lambda n: (n, 0, 0)),
            # Flat out1 copy with a (Wp+1)-wide zero margin on both ends so
            # all 9 conv2 taps are in-bounds static windows.
            scratch_shapes=[pltpu.VMEM((planes, S + 2 * (Wp + 1)), jnp.float32)],
        ),
        compiler_params=pltpu.CompilerParams(
            dimension_semantics=("parallel",)),
    )(xp, mask, w1, b1c, w2, b2c, w3sc, b3c)

    # Already NCHW; drop the padded ring.
    out = out_flat.reshape(N, out_planes, Hp, Wp)[:, :, 1:H + 1, 1:W + 1]
    return out


# ----------------------------------------------------------------------------
# Pure-JAX reference (NCHW, mirrors the PyTorch forward exactly, f32)
# ----------------------------------------------------------------------------
def reference_forward(x, params):
    def conv(y, w, stride=1, pad=0):
        return jax.lax.conv_general_dilated(
            y, w, (stride, stride), [(pad, pad), (pad, pad)],
            dimension_numbers=("NCHW", "OIHW", "NCHW"))

    def bn(y, g, b, m, v):
        g, b, m, v = (t[None, :, None, None] for t in (g, b, m, v))
        return g * (y - m) / jnp.sqrt(v + EPS) + b

    out = jax.nn.relu(bn(conv(x, params["w1"]), *params["bn1"]))
    out = jax.nn.relu(bn(conv(out, params["w2"], 1, 1), *params["bn2"]))
    out = bn(conv(out, params["w3"]), *params["bn3"])
    sc = bn(conv(x, params["wsc"]), *params["bnsc"])
    return jax.nn.relu(out + sc)


if __name__ == "__main__":
    key = jax.random.PRNGKey(0)
    k_x, k_p = jax.random.split(key)

    in_planes, planes = 4, 4           # stride=1, use_cbam=False
    N, H, W = 2, 16, 16
    x = jax.random.normal(k_x, (N, in_planes, H, W), jnp.float32)
    params = make_params(k_p, in_planes, planes)

    out = jax.jit(bottleneck_forward)(x, params)
    out = jax.block_until_ready(out)

    ref = reference_forward(x, params)
    assert out.shape == (N, EXPANSION * planes, H, W), out.shape
    # bf16 MXU operands (3 chained stages) -> loosened tolerance vs. f32 ref.
    assert jnp.allclose(out, ref, atol=1e-1, rtol=1e-1), (
        float(jnp.max(jnp.abs(out - ref))))

    print("KERNEL_OK")
</pallas_src>

<mosaic_0001>
module attributes {stable_mosaic.version = 11 : i64} {
  func.func @_bottleneck_kernel(%arg0: i32, %arg1: memref<1x4x324xbf16, #tpu.memory_space<vmem>>, %arg2: memref<1x324xf32, #tpu.memory_space<vmem>>, %arg3: memref<4x4xbf16, #tpu.memory_space<vmem>>, %arg4: memref<4x1xf32, #tpu.memory_space<vmem>>, %arg5: memref<4x36xbf16, #tpu.memory_space<vmem>>, %arg6: memref<4x1xf32, #tpu.memory_space<vmem>>, %arg7: memref<16x8xbf16, #tpu.memory_space<vmem>>, %arg8: memref<16x1xf32, #tpu.memory_space<vmem>>, %arg9: memref<1x16x324xf32, #tpu.memory_space<vmem>>, %arg10: memref<4x362xf32, #tpu.memory_space<vmem>>) attributes {dimension_semantics = [#tpu.dimension_semantics<parallel>], iteration_bounds = array<i64: 2>, scalar_prefetch = 0 : i64, scratch_operands = 1 : i64, tpu.core_type = #tpu.core_type<tc>, window_params = [{transform_indices = @transform_0, window_bounds = array<i64: 1, 4, 324>}, {pipeline_mode = #tpu.pipeline_mode<synchronous>, transform_indices = @transform_1, window_bounds = array<i64: 1, 324>}, {pipeline_mode = #tpu.pipeline_mode<synchronous>, transform_indices = @transform_2, window_bounds = array<i64: 4, 4>}, {pipeline_mode = #tpu.pipeline_mode<synchronous>, transform_indices = @transform_3, window_bounds = array<i64: 4, 1>}, {pipeline_mode = #tpu.pipeline_mode<synchronous>, transform_indices = @transform_4, window_bounds = array<i64: 4, 36>}, {pipeline_mode = #tpu.pipeline_mode<synchronous>, transform_indices = @transform_5, window_bounds = array<i64: 4, 1>}, {pipeline_mode = #tpu.pipeline_mode<synchronous>, transform_indices = @transform_6, window_bounds = array<i64: 16, 8>}, {pipeline_mode = #tpu.pipeline_mode<synchronous>, transform_indices = @transform_7, window_bounds = array<i64: 16, 1>}, {transform_indices = @transform_8, window_bounds = array<i64: 1, 16, 324>}]} {
    %c0 = arith.constant 0 : index
    %c0_0 = arith.constant 0 : index
    %c0_1 = arith.constant 0 : index
    %0 = vector.load %arg1[%c0, %c0_0, %c0_1] : memref<1x4x324xbf16, #tpu.memory_space<vmem>>, vector<1x4x324xbf16>
    %1 = vector.shape_cast %0 : vector<1x4x324xbf16> to vector<4x324xbf16>
    %c0_2 = arith.constant 0 : index
    %c0_3 = arith.constant 0 : index
    %2 = vector.load %arg2[%c0_2, %c0_3] : memref<1x324xf32, #tpu.memory_space<vmem>>, vector<1x324xf32>
    %c0_4 = arith.constant 0 : index
    %c0_5 = arith.constant 0 : index
    %3 = vector.load %arg3[%c0_4, %c0_5] : memref<4x4xbf16, #tpu.memory_space<vmem>>, vector<4x4xbf16>
    %cst = arith.constant dense<0.000000e+00> : vector<4x324xf32>
    %4 = tpu.matmul %3, %1, %cst {dimension_numbers = #tpu.dot_dimension_numbers<[1], [0], [0], [1], [0, 0, 1, 1], [], []>} : vector<4x4xbf16>, vector<4x324xbf16>, vector<4x324xf32> -> vector<4x324xf32>
    %c0_6 = arith.constant 0 : index
    %c0_7 = arith.constant 0 : index
    %5 = vector.load %arg4[%c0_6, %c0_7] : memref<4x1xf32, #tpu.memory_space<vmem>>, vector<4x1xf32>
    %6 = vector.broadcast %5 : vector<4x1xf32> to vector<4x324xf32>
    %7 = arith.addf %4, %6 : vector<4x324xf32>
    %cst_8 = arith.constant 0.000000e+00 : f32
    %8 = vector.broadcast %cst_8 : f32 to vector<4x324xf32>
    %9 = arith.maximumf %7, %8 : vector<4x324xf32>
    %10 = vector.broadcast %2 : vector<1x324xf32> to vector<4x324xf32>
    %11 = arith.mulf %9, %10 : vector<4x324xf32>
    %cst_9 = arith.constant 0.000000e+00 : f32
    %12 = vector.broadcast %cst_9 : f32 to vector<4x19xf32>
    %c0_10 = arith.constant 0 : index
    %c0_11 = arith.constant 0 : index
    %13 = vector.load %arg10[%c0_10, %c0_11] : memref<4x362xf32, #tpu.memory_space<vmem>>, vector<4x19xf32>
    tpu.vector_store %arg10[%c0_10, %c0_11], %12 {strides = array<i32>} : memref<4x362xf32, #tpu.memory_space<vmem>>, vector<4x19xf32>,
    %cst_12 = arith.constant 0.000000e+00 : f32
    %14 = vector.broadcast %cst_12 : f32 to vector<4x19xf32>
    %c0_13 = arith.constant 0 : index
    %c343 = arith.constant 343 : index
    %15 = vector.load %arg10[%c0_13, %c343] : memref<4x362xf32, #tpu.memory_space<vmem>>, vector<4x19xf32>
    tpu.vector_store %arg10[%c0_13, %c343], %14 {strides = array<i32>} : memref<4x362xf32, #tpu.memory_space<vmem>>, vector<4x19xf32>,
    %c0_14 = arith.constant 0 : index
    %c19 = arith.constant 19 : index
    %16 = vector.load %arg10[%c0_14, %c19] : memref<4x362xf32, #tpu.memory_space<vmem>>, vector<4x324xf32>
    tpu.vector_store %arg10[%c0_14, %c19], %11 {strides = array<i32>} : memref<4x362xf32, #tpu.memory_space<vmem>>, vector<4x324xf32>,
    %c0_15 = arith.constant 0 : index
    %c0_16 = arith.constant 0 : index
    %17 = vector.load %arg10[%c0_15, %c0_16] : memref<4x362xf32, #tpu.memory_space<vmem>>, vector<4x324xf32>
    %c0_17 = arith.constant 0 : index
    %c1 = arith.constant 1 : index
    %18 = vector.load %arg10[%c0_17, %c1] : memref<4x362xf32, #tpu.memory_space<vmem>>, vector<4x324xf32>
    %c0_18 = arith.constant 0 : index
    %c2 = arith.constant 2 : index
    %19 = vector.load %arg10[%c0_18, %c2] : memref<4x362xf32, #tpu.memory_space<vmem>>, vector<4x324xf32>
    %c0_19 = arith.constant 0 : index
    %c18 = arith.constant 18 : index
    %20 = vector.load %arg10[%c0_19, %c18] : memref<4x362xf32, #tpu.memory_space<vmem>>, vector<4x324xf32>
    %c0_20 = arith.constant 0 : index
    %c19_21 = arith.constant 19 : index
    %21 = vector.load %arg10[%c0_20, %c19_21] : memref<4x362xf32, #tpu.memory_space<vmem>>, vector<4x324xf32>
    %c0_22 = arith.constant 0 : index
    %c20 = arith.constant 20 : index
    %22 = vector.load %arg10[%c0_22, %c20] : memref<4x362xf32, #tpu.memory_space<vmem>>, vector<4x324xf32>
    %c0_23 = arith.constant 0 : index
    %c36 = arith.constant 36 : index
    %23 = vector.load %arg10[%c0_23, %c36] : memref<4x362xf32, #tpu.memory_space<vmem>>, vector<4x324xf32>
    %c0_24 = arith.constant 0 : index
    %c37 = arith.constant 37 : index
    %24 = vector.load %arg10[%c0_24, %c37] : memref<4x362xf32, #tpu.memory_space<vmem>>, vector<4x324xf32>
    %c0_25 = arith.constant 0 : index
    %c38 = arith.constant 38 : index
    %25 = vector.load %arg10[%c0_25, %c38] : memref<4x362xf32, #tpu.memory_space<vmem>>, vector<4x324xf32>
    %26 = tpu.concatenate %17, %18, %19, %20, %21, %22, %23, %24, %25 in 0 : vector<4x324xf32>, vector<4x324xf32>, vector<4x324xf32>, vector<4x324xf32>, vector<4x324xf32>, vector<4x324xf32>, vector<4x324xf32>, vector<4x324xf32>, vector<4x324xf32> -> vector<36x324xf32>
    %27 = arith.truncf %26 : vector<36x324xf32> to vector<36x324xbf16>
    %c0_26 = arith.constant 0 : index
    %c0_27 = arith.constant 0 : index
    %28 = vector.load %arg5[%c0_26, %c0_27] : memref<4x36xbf16, #tpu.memory_space<vmem>>, vector<4x36xbf16>
    %cst_28 = arith.constant dense<0.000000e+00> : vector<4x324xf32>
    %29 = tpu.matmul %28, %27, %cst_28 {dimension_numbers = #tpu.dot_dimension_numbers<[1], [0], [0], [1], [0, 0, 1, 1], [], []>} : vector<4x36xbf16>, vector<36x324xbf16>, vector<4x324xf32> -> vector<4x324xf32>
    %c0_29 = arith.constant 0 : index
    %c0_30 = arith.constant 0 : index
    %30 = vector.load %arg6[%c0_29, %c0_30] : memref<4x1xf32, #tpu.memory_space<vmem>>, vector<4x1xf32>
    %31 = vector.broadcast %30 : vector<4x1xf32> to vector<4x324xf32>
    %32 = arith.addf %29, %31 : vector<4x324xf32>
    %cst_31 = arith.constant 0.000000e+00 : f32
    %33 = vector.broadcast %cst_31 : f32 to vector<4x324xf32>
    %34 = arith.maximumf %32, %33 : vector<4x324xf32>
    %35 = arith.truncf %34 : vector<4x324xf32> to vector<4x324xbf16>
    %36 = tpu.concatenate %35, %1 in 0 : vector<4x324xbf16>, vector<4x324xbf16> -> vector<8x324xbf16>
    %c0_32 = arith.constant 0 : index
    %c0_33 = arith.constant 0 : index
    %37 = vector.load %arg7[%c0_32, %c0_33] : memref<16x8xbf16, #tpu.memory_space<vmem>>, vector<16x8xbf16>
    %cst_34 = arith.constant dense<0.000000e+00> : vector<16x324xf32>
    %38 = tpu.matmul %37, %36, %cst_34 {dimension_numbers = #tpu.dot_dimension_numbers<[1], [0], [0], [1], [0, 0, 1, 1], [], []>} : vector<16x8xbf16>, vector<8x324xbf16>, vector<16x324xf32> -> vector<16x324xf32>
    %c0_35 = arith.constant 0 : index
    %c0_36 = arith.constant 0 : index
    %39 = vector.load %arg8[%c0_35, %c0_36] : memref<16x1xf32, #tpu.memory_space<vmem>>, vector<16x1xf32>
    %40 = vector.broadcast %39 : vector<16x1xf32> to vector<16x324xf32>
    %41 = arith.addf %38, %40 : vector<16x324xf32>
    %cst_37 = arith.constant 0.000000e+00 : f32
    %42 = vector.broadcast %cst_37 : f32 to vector<16x324xf32>
    %43 = arith.maximumf %41, %42 : vector<16x324xf32>
    %c0_38 = arith.constant 0 : index
    %c0_39 = arith.constant 0 : index
    %c0_40 = arith.constant 0 : index
    %44 = vector.load %arg9[%c0_38, %c0_39, %c0_40] : memref<1x16x324xf32, #tpu.memory_space<vmem>>, vector<1x16x324xf32>
    %45 = vector.shape_cast %44 : vector<1x16x324xf32> to vector<16x324xf32>
    %46 = vector.shape_cast %43 : vector<16x324xf32> to vector<1x16x324xf32>
    tpu.vector_store %arg9[%c0_38, %c0_39, %c0_40], %46 {strides = array<i32>} : memref<1x16x324xf32, #tpu.memory_space<vmem>>, vector<1x16x324xf32>,
    return
  }
  func.func @transform_0(%arg0: i32) -> (i32, i32, i32) {
    %c0_i32 = arith.constant 0 : i32
    %c0_i32_0 = arith.constant 0 : i32
    %c0_i32_1 = arith.constant 0 : i32
    return %arg0, %c0_i32, %c0_i32_0 : i32, i32, i32
  }
  func.func @transform_1(%arg0: i32) -> (i32, i32) {
    %c0_i32 = arith.constant 0 : i32
    %c0_i32_0 = arith.constant 0 : i32
    %c0_i32_1 = arith.constant 0 : i32
    return %c0_i32, %c0_i32_0 : i32, i32
  }
  func.func @transform_2(%arg0: i32) -> (i32, i32) {
    %c0_i32 = arith.constant 0 : i32
    %c0_i32_0 = arith.constant 0 : i32
    %c0_i32_1 = arith.constant 0 : i32
    return %c0_i32, %c0_i32_0 : i32, i32
  }
  func.func @transform_3(%arg0: i32) -> (i32, i32) {
    %c0_i32 = arith.constant 0 : i32
    %c0_i32_0 = arith.constant 0 : i32
    %c0_i32_1 = arith.constant 0 : i32
    return %c0_i32, %c0_i32_0 : i32, i32
  }
  func.func @transform_4(%arg0: i32) -> (i32, i32) {
    %c0_i32 = arith.constant 0 : i32
    %c0_i32_0 = arith.constant 0 : i32
    %c0_i32_1 = arith.constant 0 : i32
    return %c0_i32, %c0_i32_0 : i32, i32
  }
  func.func @transform_5(%arg0: i32) -> (i32, i32) {
    %c0_i32 = arith.constant 0 : i32
    %c0_i32_0 = arith.constant 0 : i32
    %c0_i32_1 = arith.constant 0 : i32
    return %c0_i32, %c0_i32_0 : i32, i32
  }
  func.func @transform_6(%arg0: i32) -> (i32, i32) {
    %c0_i32 = arith.constant 0 : i32
    %c0_i32_0 = arith.constant 0 : i32
    %c0_i32_1 = arith.constant 0 : i32
    return %c0_i32, %c0_i32_0 : i32, i32
  }
  func.func @transform_7(%arg0: i32) -> (i32, i32) {
    %c0_i32 = arith.constant 0 : i32
    %c0_i32_0 = arith.constant 0 : i32
    %c0_i32_1 = arith.constant 0 : i32
    return %c0_i32, %c0_i32_0 : i32, i32
  }
  func.func @transform_8(%arg0: i32) -> (i32, i32, i32) {
    %c0_i32 = arith.constant 0 : i32
    %c0_i32_0 = arith.constant 0 : i32
    %c0_i32_1 = arith.constant 0 : i32
    return %arg0, %c0_i32, %c0_i32_0 : i32, i32, i32
  }
}

</mosaic_0001>

<bundles_post_ra>
// kernel: bottleneck_forward.1
= control target key start
LH: loop header
LB: loop body
LE: loop exit
PB: predicated region body
PF: predicated region fallthrough
CT: control target
= control target key end

     0   :  { %s1091_s27 = smov 0   ;;  %s1226_s0 = inlined_call_operand.vmem [shape: bf16[2,4,324], index: 0, kind: input, shape index: {}]   ;;  %s1227_s1 = inlined_call_operand.vmem [shape: f32[1,324], index: 1, kind: input, shape index: {}]   ;;  %s1228_s2 = inlined_call_operand.vmem [shape: bf16[4,4], index: 2, kind: input, shape index: {}]   ;;  %s1229_s3 = inlined_call_operand.vmem [shape: f32[4,1], index: 3, kind: input, shape index: {}]   ;;  %s1230_s4 = inlined_call_operand.vmem [shape: bf16[4,36], index: 4, kind: input, shape index: {}]   ;;  %s1231_s5 = inlined_call_operand.vmem [shape: f32[4,1], index: 5, kind: input, shape index: {}]   ;;  %s1232_s6 = inlined_call_operand.vmem [shape: bf16[16,8], index: 6, kind: input, shape index: {}]   ;;  %s1233_s7 = inlined_call_operand.vmem [shape: f32[16,1], index: 7, kind: input, shape index: {}]   ;;  %s1234_s8 = inlined_call_operand.vmem [shape: f32[2,16,324], index: 8, kind: output, shape index: {}]  }
   0x1 LB: > { %s905_s28 = sadd.s32 4294967295, %s1031_s27   ;;  %p909_p0 = scmp.ge.s32.totalorder %s1031_s27, 1  ;;  %s1031_s27 = sphi %s1091_s27, %s18_s27  }
   0x2   : > { %p262_p1 = scmp.lt.s32.totalorder %s1031_s27, 3 }
   0x4   : > { %p263_p2 = pnand %p909_p0, %p262_p1 }
   0x5   : > { %p296_p3 = scmp.lt.s32.totalorder (!%p263_p2), %s905_s28, 1  ;;  %s1037_s17 = smov (!%p263_p2), 19  }
   0x6   : > { %266 = sbr.rel (%p263_p2) target bundleno = 916 (0x394), region = 52  ;;  %s1038_s18 = smov (!%p263_p2), 109  }
   0x7   : > { %s1039_s19 = smov (!%p263_p2), 90   ;;  %s1040_s20 = smov (!%p263_p2), 92  }
   0x8   : > { %s1041_s21 = smov (!%p263_p2), 108   ;;  %s1042_s22 = smov (!%p263_p2), 91  }
   0x9   : > { %s1043_s23 = smov (!%p263_p2), 127   ;;  %s1044_s24 = smov (!%p263_p2), 126  }
   0xa   : > { %s1045_s25 = smov (!%p263_p2), 110  }
   0xb   : > { %v321_v0 = vlaneseq  ;;  %v1033_v1 = vmov 1983009808   ;;  %v1034_v3 = vmov 0.0   ;;  %s1236_s28 = smov (!%p296_p3, %s905_s28), 1  ;;  %v1035_v5 = vmov 0   ;;  %v726_v56 = vld [vmem:[%s1233_s7] sm:$0xff] }
   0xc   : > { %v319_v2 = vunpack.c.l.s4 %v1033_v1  ;;  %932 = vmatprep.subr.bf16.mxu1 %v1034_v3  ;;  %379 = vmatprep.mubr.bf16.mxu0 %v1035_v5  ;;  %vm1036_vm0 = vmmov 0   ;;  %v310_v6 = vld [vmem:[%s1229_s3] sm:$0xf]  ;;  %s954_s9 = smul.u32 6, %s1236_s28  ;;  %vm337_vm1 = vcmask 1041408   ;;  %vm333_vm2 = vcmask 31744  }
   0xd   : > { %v322_v4 = vshrl.u32 %v321_v0, 7  ;;  %934 = vmatprep.mubr.msk.bf16.mxu1 %vm1036_vm0, %v1034_v3  ;;  %977 = vset.pattern.permute.xlu0 %v1035_v5  ;;  %v309_v16 = vld [vmem:[%s1228_s2] sm:$0x3]  ;;  %vm450_vm3 = vcmask 150528   ;;  %vm452_vm4 = vcmask 863928   ;;  %vm468_vm5 = vcmask 1043608  }
   0xe   : > { %v320_v7 = vunpack.c.0.s8 %v319_v2  ;;  %1018 = vset.pattern.permute.xlu1 %v1035_v5  ;;  %313 = vperm.xlu0 %977, %v310_v6   ;;  %s300_s12 = scalar_lea.vmem %s1226_s0, %s954_s9  ;;  %451 = vst.msk [vmem:[#allocation2] sm:$0xf] %vm450_vm3, %v1034_v3  ;;  %v308_v20 = vld [vmem:[%s1227_s1] sm:$0x7]  ;;  %vm469_vm6 = vcmask 1047556   ;;  %vm463_vm7 = vcmask 154624  }
   0xf   : > { %v1116_v9 = vld [vmem:[%s300_s12] sm:$0x3f]  ;;  %453 = vst.msk [vmem:[#allocation2 + $0x8] sm:$0xf] %vm452_vm4, %v1034_v3  ;;  %v442_v17 = vsub.s32 2, %v322_v4  ;;  %v434_v19 = vsub.s32 0, %v322_v4  ;;  %vm470_vm8 = vmor %vm469_vm6, %vm468_vm5 }
  0x10   : > { %v1111_v8 = vsub.s32 %v320_v7, %v322_v4  ;;  %v317_v11 = vcombine.high %v1116_v9, %v1116_v9  ;;  %v438_v21 = vsub.s32 1, %v322_v4  ;;  %vm472_vm9 = vcmask 707584   ;;  %v601_v57 = vld [vmem:[%s1231_s5] sm:$0xf]  ;;  %v727_v58 = vld [vmem:[%s1233_s7 + $0x8] sm:$0xff]  ;;  %s955_s16 = smul.u32 48, %s1236_s28 }
  0x11   : > { %v443_v26 = vrot.slane %v308_v20, %v442_v17  ;;  %v435_v27 = vrot.slane %v308_v20, %v434_v19  ;;  %vm572_vm10 = vcmask 736256   ;;  %vm536_vm11 = vcmask 883712  }
  0x12   : > { %v1120_v10 = vrot.slane %v1116_v9, %v1111_v8  ;;  %v331_v14 = vrot.slane %v317_v11, %v1111_v8  ;;  %v439_v33 = vrot.slane %v308_v20, %v438_v21  ;;  %vm524_vm12 = vcmask 891904  }
  0x13   : > { %vm578_vm13 = vcmask 1043456   ;;  %vm560_vm14 = vcmask 744448   ;;  %vm548_vm15 = vcmask 752640   ;;  %vm512_vm3 = vcmask 900096  }
  0x14   : > { %v332_v12 = vcombine.high %v1120_v10, %v1120_v10  ;;  %v339_v13 = vsel %vm337_vm1, %v1120_v10, 0  ;;  %v345_v15 = vsel %vm337_vm1, %v331_v14, 0  ;;  %vm500_vm4 = vcmask 1031168  }
  0x15   : > { %933 = vmatpush3.bf16.msra.mxu1 %v345_v15  ;;  %vm607_vm5 = vcmask 293888   ;;  %vm845_vm6 = vcmask 556032  }
  0x16   : > { %912 = vmatprep.subr.msk.bf16.mxu0 %vm337_vm1, %v332_v12  ;;  %938 = vmatprep.subr.bf16.mxu1 %v1034_v3 }
  0x17   : > { %362 = vmatpush1.bf16.msra.mxu0 %v339_v13 }
  0x18   : > { %935 = vmatmul.mubr.msk.bf16.vlgmr.msra.gmra.mxu1 %vm333_vm2, %v309_v16 }
  0x19   : > { %944 = vmatprep.mubr.msk.bf16.mxu1 %vm1036_vm0, %v1034_v3 }
  0x1a   : > { %913 = vmatmul.mubr.msk.bf16.vlgmr.msra.gmra.mxu0 %vm333_vm2, %v309_v16  ;;  %vm488_vm2 = vcmask 1039360  }
  0x1b   : > { %652 = vmatprep.mubr.bf16.mxu0 %v1035_v5 }
  0x89   : > { %v314_v18 = vpop.permute.xlu0 %313 }
  0xd8   : > { %v422_v23 = vpop.f32.mrf.mxu1 }
  0xd9   : > { %v423_v25 = vadd.f32 %v422_v23, %v314_v18 }
  0xda   : > { %v381_v22 = vpop.f32.mrf.mxu0  ;;  %v936_v29 = vpop.f32.mrf.mxu1 }
  0xdb   : > { %v382_v24 = vadd.f32 %v381_v22, %v314_v18  ;;  %v430_v31 = vmax.f32 %v423_v25, 0.0 }
  0xdc   : > { %v383_v28 = vpop.f32.mrf.mxu0  ;;  %v425_v35 = vpop.f32.mrf.mxu1 }
  0xdd   : > { %v428_v30 = vmax.f32 %v382_v24, 0.0  ;;  %v384_v32 = vadd.f32 %v383_v28, %v314_v18  ;;  %v449_v37 = vmul.f32 %v443_v26, %v430_v31 }
  0xde   : > { %v385_v34 = vpop.f32.mrf.mxu0  ;;  %v937_v39 = vpop.f32.mrf.mxu1 }
  0xdf   : > { %v429_v36 = vmax.f32 %v384_v32, 0.0  ;;  %v447_v40 = vmul.f32 %v435_v27, %v428_v30  ;;  %460 = vrot.lane.b32.xlu1 %v449_v37, %s1037_s17 }
  0xe0   : > { %v386_v38 = vpop.f32.mrf.mxu0 }
  0xe1   : > { %v448_v41 = vmul.f32 %v439_v33, %v429_v36 }
  0xe3   : > { %v457_v42 = vcombine.low %v447_v40, %v448_v41 }
  0xe5   : > { %458 = vrot.lane.b32.xlu0 %v457_v42, %s1037_s17 }
 0x151   : > { %v461_v45 = vpop.permute.xlu1 %460 }
 0x157   : > { %v459_v43 = vpop.permute.xlu0 %458 }
 0x158   : > { %v462_v44 = vrot.slane %v459_v43, 4 }
 0x15a   : > { %v464_v46 = vsel %vm463_vm7, %v462_v44, %v459_v43  ;;  %v465_v47 = vsel %vm463_vm7, %v462_v44, %v461_v45 }
 0x15b   : > { %471 = vst.msk [vmem:[#allocation2] sm:$0xff] %vm470_vm8, %v464_v46 }
 0x15c   : > { %473 = vst.msk [vmem:[#allocation2 + $0x8] sm:$0xf] %vm472_vm9, %v465_v47 }
 0x162   : > { %v1143_v48 = vld [vmem:[#allocation2] sm:$0xff] }
 0x163   : > { %v1145_v49 = vld [vmem:[#allocation2 + $0x8] sm:$0xf]  ;;  %518 = vrot.lane.b32.xlu1 %v1143_v48, %s1038_s18  ;;  %v1154_v52 = vcombine.high %v1143_v48, %v1143_v48  ;;  %v480_v55 = vcombine.low %v1143_v48, %v1143_v48 }
 0x164   : > { %570 = vrot.lane.b32.xlu0 %v1145_v49, %s1039_s19  ;;  %v481_v50 = vcombine.low %v1145_v49, %v1145_v49 }
 0x165   : > { %v978_v53 = vpack.i.bf16 %v1154_v52, %v1143_v48  ;;  %v983_v54 = vpack.i.bf16 %v1145_v49, %v1154_v52 }
 0x166   : > { %v988_v51 = vpack.i.bf16 %v481_v50, %v1143_v48 }
 0x167   : > { %542 = vrot.lane.b32.xlu1 %v1143_v48, %s1040_s20 }
 0x168   : > { %989 = vrot.lane.b32.xlu0 %v988_v51, %s1041_s21 }
 0x16b   : > { %979 = vrot.lane.b32.xlu1 %v978_v53, %s1039_s19  ;;  %s305_s19 = scalar_lea.vmem %s1234_s8, %s955_s16 }
 0x16c   : > { %999 = vrot.lane.b32.xlu0 %v988_v51, %s1042_s22 }
 0x16f   : > { %984 = vrot.lane.b32.xlu1 %v983_v54, %s1038_s18 }
 0x170   : > { %530 = vrot.lane.b32.xlu0 %v480_v55, %s1041_s21 }
 0x173   : > { %994 = vrot.lane.b32.xlu1 %v983_v54, %s1040_s20 }
 0x174   : > { %554 = vrot.lane.b32.xlu0 %v480_v55, %s1042_s22 }
 0x177   : > { %1004 = vrot.lane.b32.xlu1 %v988_v51, %s1043_s23 }
 0x178   : > { %1009 = vrot.lane.b32.xlu0 %v983_v54, %s1044_s24 }
 0x17b   : > { %1014 = vrot.lane.b32.xlu1 %v988_v51, %s1045_s25 }
 0x17c   : > { %482 = vrot.lane.b32.xlu0 %v480_v55, %s1043_s23 }
 0x17f   : > { %494 = vrot.lane.b32.xlu1 %v1143_v48, %s1044_s24 }
 0x180   : > { %506 = vrot.lane.b32.xlu0 %v480_v55, %s1045_s25 }
 0x183   : > { %604 = vperm.xlu1 %1018, %v601_v57  }
 0x184   : > { %730 = vperm.xlu0 %977, %v726_v56  }
 0x187   : > { %735 = vperm.xlu1 %1018, %v727_v58  }
 0x1d5   : > { %v519_v60 = vpop.permute.xlu1 %518 }
 0x1d6   : > { %v571_v59 = vpop.permute.xlu0 %570 }
 0x1d7   : > { %v599_v61 = vpack.c.bf16 %v571_v59, %v571_v59 }
 0x1d9   : > { %v618_v62 = vsel %vm337_vm1, %v599_v61, 0  ;;  %v543_v0 = vpop.permute.xlu1 %542 }
 0x1da   : > { %939 = vmatpush3.bf16.msra.mxu1 %v618_v62  ;;  %v990_v63 = vpop.permute.xlu0 %989 }
 0x1db   : > { %940 = vmatprep.subr.bf16.mxu1 %v1034_v3  ;;  %v992_v16 = vunpack.i.h.bf16 %v990_v63  ;;  %v991_v17 = vunpack.i.l.bf16 %v990_v63 }
 0x1dd   : > { %v980_v2 = vpop.permute.xlu1 %979  ;;  %v538_v25 = vsel %vm536_vm11, %v991_v17, %v992_v16 }
 0x1de   : > { %v1000_v1 = vpop.permute.xlu0 %999  ;;  %v982_v4 = vunpack.i.h.bf16 %v980_v2  ;;  %v981_v6 = vunpack.i.l.bf16 %v980_v2 }
 0x1df   : > { %v1002_v18 = vunpack.i.h.bf16 %v1000_v1  ;;  %v1001_v19 = vunpack.i.l.bf16 %v1000_v1 }
 0x1e0   : > { %v574_v7 = vsel %vm572_vm10, %v982_v4, %v571_v59  ;;  %v573_v11 = vsel %vm572_vm10, %v981_v6, %v982_v4 }
 0x1e1   : > { %v598_v12 = vpack.c.bf16 %v574_v7, %v574_v7  ;;  %v985_v14 = vpop.permute.xlu1 %984  ;;  %v597_v15 = vpack.c.bf16 %v573_v11, %v573_v11  ;;  %v562_v31 = vsel %vm560_vm14, %v1001_v19, %v1002_v18 }
 0x1e2   : > { %v531_v13 = vpop.permute.xlu0 %530  ;;  %v987_v20 = vunpack.i.h.bf16 %v985_v14  ;;  %v986_v21 = vunpack.i.l.bf16 %v985_v14 }
 0x1e3   : > { %915 = vmatprep.subr.msk.bf16.mxu0 %vm337_vm1, %v598_v12  ;;  %v612_v22 = vsel %vm337_vm1, %v597_v15, 0  ;;  %v537_v36 = vsel %vm536_vm11, %v531_v13, %v991_v17  ;;  %v600_v13 = vld [vmem:[%s1230_s4] sm:$0x3] }
 0x1e4   : > { %631 = vmatpush1.bf16.msra.mxu0 %v612_v22  ;;  %v587_v28 = vsel %vm578_vm13, %v987_v20, %v992_v16  ;;  %v525_v29 = vsel %vm524_vm12, %v519_v60, %v986_v21  ;;  %v526_v30 = vsel %vm524_vm12, %v986_v21, %v987_v20 }
 0x1e5   : > { %v995_v24 = vpop.permute.xlu1 %994  ;;  %v586_v44 = vsel %vm578_vm13, %v526_v30, %v538_v25  ;;  %v585_v45 = vsel %vm578_vm13, %v525_v29, %v537_v36  ;;  %v1024_v30 = vld [vmem:[%s1232_s6] sm:$0xff]  }
 0x1e6   : > { %v555_v23 = vpop.permute.xlu0 %554  ;;  %v997_v26 = vunpack.i.h.bf16 %v995_v24  ;;  %v996_v27 = vunpack.i.l.bf16 %v995_v24 }
 0x1e7   : > { %v561_v32 = vsel %vm560_vm14, %v555_v23, %v1001_v19 }
 0x1e8   : > { %v590_v33 = vsel %vm578_vm13, %v997_v26, %v1002_v18  ;;  %v549_v34 = vsel %vm548_vm15, %v543_v0, %v996_v27  ;;  %v550_v35 = vsel %vm548_vm15, %v996_v27, %v997_v26 }
 0x1e9   : > { %v596_v37 = vpack.c.bf16 %v590_v33, %v587_v28  ;;  %v1005_v39 = vpop.permute.xlu1 %1004  ;;  %v589_v40 = vsel %vm578_vm13, %v550_v35, %v562_v31  ;;  %v588_v41 = vsel %vm578_vm13, %v549_v34, %v561_v32 }
 0x1ea   : > { %v1010_v38 = vpop.permute.xlu0 %1009  ;;  %v1007_v42 = vunpack.i.h.bf16 %v1005_v39  ;;  %v1006_v43 = vunpack.i.l.bf16 %v1005_v39  ;;  %v595_v46 = vpack.c.bf16 %v589_v40, %v586_v44  ;;  %v594_v47 = vpack.c.bf16 %v588_v41, %v585_v45 }
 0x1eb   : > { %941 = vmatpush3.bf16.msra.mxu1 %v596_v37  ;;  %v1012_v50 = vunpack.i.h.bf16 %v1010_v38  ;;  %v1011_v51 = vunpack.i.l.bf16 %v1010_v38 }
 0x1ec   : > { %942 = vmatprep.subr.bf16.mxu1 %v1034_v3  ;;  %632 = vmatprep.subr.bf16.mxu0 %v595_v46  ;;  %v490_v55 = vsel %vm488_vm2, %v1006_v43, %v1007_v42  ;;  %v581_v58 = vsel %vm578_vm13, %v1145_v49, %v1007_v42 }
 0x1ed   : > { %v1015_v54 = vpop.permute.xlu1 %1014  ;;  %633 = vmatpush1.bf16.msra.mxu0 %v594_v47  ;;  %v502_v62 = vsel %vm500_vm4, %v1011_v51, %v1012_v50  ;;  %v580_v2 = vsel %vm578_vm13, %v1154_v52, %v490_v55  ;;  %v707_v52 = vcombine.low %v1116_v9, %v1116_v9 }
 0x1ee   : > { %v483_v53 = vpop.permute.xlu0 %482  ;;  %v1017_v56 = vunpack.i.h.bf16 %v1015_v54  ;;  %v1016_v57 = vunpack.i.l.bf16 %v1015_v54 }
 0x1ef   : > { %v489_v59 = vsel %vm488_vm2, %v483_v53, %v1006_v43  ;;  %v714_v22 = vrot.slane %v707_v52, %v1111_v8 }
 0x1f0   : > { %v584_v60 = vsel %vm578_vm13, %v1012_v50, %v1017_v56  ;;  %v514_v61 = vsel %vm512_vm3, %v1016_v57, %v1017_v56  ;;  %v579_v11 = vsel %vm578_vm13, %v1143_v48, %v489_v59 }
 0x1f1   : > { %v593_v63 = vpack.c.bf16 %v584_v60, %v581_v58  ;;  %v495_v1 = vpop.permute.xlu1 %494  ;;  %v583_v4 = vsel %vm578_vm13, %v502_v62, %v514_v61  ;;  %v715_v31 = vcombine.high %v714_v22, %v714_v22 }
 0x1f2   : > { %v507_v0 = vpop.permute.xlu0 %506  ;;  %v501_v7 = vsel %vm500_vm4, %v495_v1, %v1011_v51  ;;  %v592_v49 = vpack.c.bf16 %v583_v4, %v580_v2 }
 0x1f3   : > { %v513_v6 = vsel %vm512_vm3, %v507_v0, %v1016_v57  ;;  %943 = vmatpush3.bf16.msra.mxu1 %v593_v63 }
 0x1f4   : > { %v582_v12 = vsel %vm578_vm13, %v501_v7, %v513_v6  ;;  %634 = vmatprep.subr.bf16.mxu0 %v592_v49  ;;  %948 = vmatprep.subr.bf16.mxu1 %v1034_v3 }
 0x1f5   : > { %v591_v14 = vpack.c.bf16 %v582_v12, %v579_v11 }
 0x1f6   : > { %945 = vmatmul.mubr.msk.bf16.vlgmr.msra.gmra.mxu1 %vm607_vm5, %v600_v13 }
 0x1f7   : > { %635 = vmatpush1.bf16.msra.mxu0 %v591_v14  ;;  %950 = vmatprep.mubr.msk.bf16.mxu1 %vm1036_vm0, %v1034_v3  ;;  %vm743_vm0 = vcmask 64512  }
 0x1fa   : > { %916 = vmatmul.mubr.msk.bf16.vlgmr.msra.gmra.mxu0 %vm607_vm5, %v600_v13 }
 0x1fb   : > { %785 = vmatprep.mubr.bf16.mxu0 %v1035_v5 }
 0x1fe   : > { %v605_v48 = vpop.permute.xlu1 %604 }
 0x1ff   : > { %v731_v35 = vpop.permute.xlu0 %730 }
 0x202   : > { %v736_v40 = vpop.permute.xlu1 %735 }
 0x2b6   : > { %v695_v15 = vpop.f32.mrf.mxu1 }
 0x2b7   : > { %v696_v16 = vadd.f32 %v695_v15, %v605_v48 }
 0x2b8   : > { %v946_v17 = vpop.f32.mrf.mxu1 }
 0x2b9   : > { %v703_v18 = vmax.f32 %v696_v16, 0.0 }
 0x2ba   : > { %v654_v19 = vpop.f32.mrf.mxu0  ;;  %v698_v21 = vpop.f32.mrf.mxu1 }
 0x2bb   : > { %v655_v20 = vadd.f32 %v654_v19, %v605_v48  ;;  %v706_v23 = vpack.c.bf16 %v703_v18, %v703_v18 }
 0x2bc   : > { %v656_v24 = vpop.f32.mrf.mxu0  ;;  %v947_v26 = vpop.f32.mrf.mxu1 }
 0x2bd   : > { %v701_v25 = vmax.f32 %v655_v20, 0.0  ;;  %v657_v3 = vadd.f32 %v656_v24, %v605_v48  ;;  %v723_v5 = vsel %vm337_vm1, %v706_v23, %v1120_v10 }
 0x2be   : > { %v658_v27 = vpop.f32.mrf.mxu0  ;;  %v751_v29 = vsel %vm578_vm13, %v723_v5, 0 }
 0x2bf   : > { %v704_v28 = vpack.c.bf16 %v701_v25, %v701_v25  ;;  %v702_v9 = vmax.f32 %v657_v3, 0.0  ;;  %949 = vmatpush3.bf16.msra.mxu1 %v751_v29 }
 0x2c0   : > { %v659_v8 = vpop.f32.mrf.mxu0 }
 0x2c1   : > { %v705_v32 = vpack.c.bf16 %v702_v9, %v702_v9  ;;  %v718_v33 = vsel %vm337_vm1, %v704_v28, %v714_v22 }
 0x2c2   : > { %951 = vmatmul.mubr.msk.bf16.vlgmr.msra.gmra.mxu1 %vm743_vm0, %v1024_v30  ;;  %v747_v10 = vsel %vm578_vm13, %v718_v33, 0 }
 0x2c3   : > { %v721_v34 = vsel %vm337_vm1, %v705_v32, %v715_v31 }
 0x2c4   : > { %919 = vmatprep.subr.msk.bf16.mxu0 %vm578_vm13, %v721_v34 }
 0x2c5   : > { %768 = vmatpush1.bf16.msra.mxu0 %v747_v10 }
 0x2c8   : > { %920 = vmatmul.mubr.msk.bf16.vlgmr.msra.gmra.mxu0 %vm743_vm0, %v1024_v30 }
 0x382   : > { %v830_v36 = vpop.f32.mrf.mxu1 }
 0x383   : > { %v831_v37 = vadd.f32 %v830_v36, %v731_v35 }
 0x384   : > { %v952_v38 = vpop.f32.mrf.mxu1 }
 0x385   : > { %v839_v39 = vmax.f32 %v831_v37, 0.0 }
 0x386   : > { %v833_v41 = vpop.f32.mrf.mxu1 }
 0x387   : > { %846 = vst.msk [vmem:[%s305_s19 + $0x10] sm:$0xff] %vm845_vm6, %v839_v39  ;;  %v834_v42 = vadd.f32 %v833_v41, %v736_v40 }
 0x388   : > { %v787_v43 = vpop.f32.mrf.mxu0  ;;  %v953_v45 = vpop.f32.mrf.mxu1 }
 0x389   : > { %v788_v44 = vadd.f32 %v787_v43, %v731_v35  ;;  %v842_v46 = vmax.f32 %v834_v42, 0.0 }
 0x38a   : > { %v789_v47 = vpop.f32.mrf.mxu0 }
 0x38b   : > { %v837_v50 = vmax.f32 %v788_v44, 0.0  ;;  %v790_v51 = vadd.f32 %v789_v47, %v731_v35  ;;  %849 = vst.msk [vmem:[%s305_s19 + $0x28] sm:$0xff] %vm845_vm6, %v842_v46 }
 0x38c   : > { %v791_v53 = vpop.f32.mrf.mxu0 }
 0x38d   : > { %843 = vst [vmem:[%s305_s19] sm:$0xff] %v837_v50  ;;  %v838_v54 = vmax.f32 %v790_v51, 0.0  ;;  %v792_v55 = vadd.f32 %v791_v53, %v736_v40 }
 0x38e   : > { %v793_v56 = vpop.f32.mrf.mxu0 }
 0x38f   : > { %844 = vst [vmem:[%s305_s19 + $0x8] sm:$0xff] %v838_v54  ;;  %v840_v57 = vmax.f32 %v792_v55, 0.0  ;;  %v794_v58 = vadd.f32 %v793_v56, %v736_v40 }
 0x391   : > { %847 = vst [vmem:[%s305_s19 + $0x18] sm:$0xff] %v840_v57  ;;  %v841_v59 = vmax.f32 %v794_v58, 0.0 }
 0x393   : > { %848 = vst [vmem:[%s305_s19 + $0x20] sm:$0xff] %v841_v59 }
 0x394 PF: > { %s18_s27 = sadd.s32 1, %s1031_s27  }
 0x395   : > { %p15_p4 = scmp.ge.s32.totalorder %s18_s27, 4  }
 0x397   :  { %17 = sbr.rel (!%p15_p4) target bundleno = 1 (0x1), region = 82 }

</bundles_post_ra>
